<compile_context>
chip_gen: v6e
topology: v6e:2x2x1
jax: 0.10.0
libtpu: 0.0.40
codegen_flags: <defaults>
</compile_context>

<pallas_src>
import functools

import jax
import jax.numpy as jnp
from jax import lax
from jax.experimental import pallas as pl
from jax.experimental.pallas import tpu as pltpu


def _head_flash_kernel(xq_ref, xkv_ref, w_ref, o_ref,
                       q_sc, m_sc, l_sc, acc_sc, *, scale):
    # xq_ref : (Bb, tq, C)  bf16   x rows for the current query tile
    # xkv_ref: (Bb, tk, C)  bf16   x rows for the current key/value tile
    # w_ref  : (C, 3*Hp)    bf16   fused, lane-padded q|k|v projection
    # o_ref  : (Bb, tq, Hp) f32    output tile (lane-dense, padded head dim)
    # q_sc   : (Bb, tq, Hp) bf16   pre-scaled q for this query tile
    # m_sc, l_sc : (Bb, tq, 1) f32 online-softmax running max / denom
    # acc_sc : (Bb, tq, Hp) f32    unnormalized output accumulator
    _, tq, _ = xq_ref.shape
    _, tk, _ = xkv_ref.shape
    Hp = o_ref.shape[-1]
    qi = pl.program_id(1)
    ki = pl.program_id(2)

    @pl.when(ki == 0)
    def _init():
        # Project q once per (batch, query-tile); fold 1/sqrt(H) into q.
        q = lax.dot_general(
            xq_ref[...], w_ref[:, 0:Hp],
            dimension_numbers=(((2,), (0,)), ((), ())),
            preferred_element_type=jnp.float32)           # (Bb, tq, Hp)
        q_sc[...] = (q * scale).astype(q_sc.dtype)
        m_sc[...] = jnp.full(m_sc.shape, -jnp.inf, dtype=jnp.float32)
        l_sc[...] = jnp.zeros(l_sc.shape, dtype=jnp.float32)
        acc_sc[...] = jnp.zeros(acc_sc.shape, dtype=jnp.float32)

    # Skip kv tiles that are entirely above the causal diagonal.
    @pl.when(ki * tk <= qi * tq + (tq - 1))
    def _update():
        # Project k and v for this kv tile (bf16 operands, f32 accumulate).
        kv = lax.dot_general(
            xkv_ref[...], w_ref[:, Hp:],
            dimension_numbers=(((2,), (0,)), ((), ())),
            preferred_element_type=jnp.float32)           # (Bb, tk, 2*Hp)
        k = kv[:, :, 0:Hp].astype(jnp.bfloat16)
        v = kv[:, :, Hp:2 * Hp].astype(jnp.bfloat16)

        # s = q @ k^T, batched on Bb, contracting the (padded) head dim.
        s = lax.dot_general(
            q_sc[...], k,
            dimension_numbers=(((2,), (2,)), ((0,), (0,))),
            preferred_element_type=jnp.float32)           # (Bb, tq, tk)

        # Causal mask: col_global <= row_global, via one relative iota vs a
        # scalar tile offset (col - row <= qi*tq - ki*tk).
        rel = (lax.broadcasted_iota(jnp.int32, (tq, tk), 1)
               - lax.broadcasted_iota(jnp.int32, (tq, tk), 0))
        mask = rel <= (qi * tq - ki * tk)
        s = jnp.where(mask[None, :, :], s, -jnp.inf)

        # Online softmax update (f32).
        m_prev = m_sc[...]
        m_new = jnp.maximum(m_prev, jnp.max(s, axis=-1, keepdims=True))
        alpha = jnp.exp(m_prev - m_new)
        p = jnp.exp(s - m_new)
        l_sc[...] = alpha * l_sc[...] + jnp.sum(p, axis=-1, keepdims=True)

        pv = lax.dot_general(
            p.astype(jnp.bfloat16), v,
            dimension_numbers=(((2,), (1,)), ((0,), (0,))),
            preferred_element_type=jnp.float32)           # (Bb, tq, Hp)
        acc_sc[...] = alpha * acc_sc[...] + pv
        m_sc[...] = m_new

    @pl.when(ki == pl.num_programs(2) - 1)
    def _finalize():
        inv_l = pl.reciprocal(l_sc[...], approx=True)
        o_ref[...] = (acc_sc[...] * inv_l).astype(o_ref.dtype)


def _round_up(n, m):
    return ((n + m - 1) // m) * m


def _vmem_capacity_bytes():
    try:
        cap = int(pltpu.get_tpu_info().vmem_capacity_bytes)
        if cap > 0:
            return cap
    except Exception:
        pass
    return 64 << 20   # v7x per-core physical VMEM: the most restrictive target


def _vmem_bytes_estimate(Bb, tq, tk, Hp, C):
    bf16, f32 = 2, 4
    xq = 2 * Bb * tq * C * bf16                 # double-buffered q-role input
    xkv = 2 * Bb * tk * C * bf16                # double-buffered kv-role input
    wgt = 1 * C * 3 * Hp * bf16                 # single-buffered fused weight
    outb = 2 * Bb * tq * Hp * f32               # double-buffered output block
    scr = Bb * tq * (Hp * bf16 + Hp * f32 + 2 * 128 * f32)
    tmp = Bb * (tk * 2 * Hp * f32 + 3 * tq * tk * f32 + tq * Hp * f32)
    return int(1.5 * (xq + xkv + wgt + outb + scr + tmp))


def _pick_batch_block(B, tq, tk, Hp, C, budget, max_rows=512):
    """Largest divisor Bb of B that fits the VMEM budget, keeps the matmul M
    tile (Bb*tq) modest, and leaves >= 2 parallel grid steps when B >= 2."""
    best = 1
    for d in range(1, B + 1):
        if B % d:
            continue
        if B >= 2 and B // d < 2:
            continue
        if d * tq > max_rows:
            continue
        if _vmem_bytes_estimate(d, tq, tk, Hp, C) > budget:
            continue
        best = d
    return best


def _make_call(B, T, C, Hp, Bb, tq, tk, out_dtype, scale, vmem_limit,
               single_buffer_w):
    grid = (B // Bb, T // tq, T // tk)
    if single_buffer_w:
        w_spec = pl.BlockSpec((C, 3 * Hp), lambda b, qi, ki: (0, 0),
                              pipeline_mode=pl.Buffered(1))
    else:
        w_spec = pl.BlockSpec((C, 3 * Hp), lambda b, qi, ki: (0, 0))

    kernel = functools.partial(_head_flash_kernel, scale=scale)
    return pl.pallas_call(
        kernel,
        out_shape=jax.ShapeDtypeStruct((B, T, Hp), out_dtype),
        grid_spec=pltpu.PrefetchScalarGridSpec(
            num_scalar_prefetch=0,
            grid=grid,
            in_specs=[
                pl.BlockSpec((Bb, tq, C), lambda b, qi, ki: (b, qi, 0)),
                pl.BlockSpec((Bb, tk, C), lambda b, qi, ki: (b, ki, 0)),
                w_spec,
            ],
            out_specs=pl.BlockSpec((Bb, tq, Hp), lambda b, qi, ki: (b, qi, 0)),
            scratch_shapes=[
                pltpu.VMEM((Bb, tq, Hp), jnp.bfloat16),   # pre-scaled q
                pltpu.VMEM((Bb, tq, 1), jnp.float32),     # running max
                pltpu.VMEM((Bb, tq, 1), jnp.float32),     # running denom
                pltpu.VMEM((Bb, tq, Hp), jnp.float32),    # unnormalized out
            ],
        ),
        compiler_params=pltpu.CompilerParams(
            dimension_semantics=("parallel", "parallel", "arbitrary"),
            vmem_limit_bytes=vmem_limit,
        ),
    )


def head_forward(x, wk, wq, wv):
    """x: (B, T, C) float32; wk/wq/wv: (C, H) float32 -> (B, T, H).

    Weights are stored as (C, H), so the projection is x @ W (equivalent to
    PyTorch's nn.Linear(C, H, bias=False), which computes x @ W.T with W (H, C)).
    """
    B, T, C = x.shape
    H = wq.shape[1]
    Hp = _round_up(H, 128)
    scale = float(H) ** -0.5

    # Query / key-value tile sizes: 128 when T allows it, else the full T.
    tq = 128 if T % 128 == 0 else T
    tk = tq

    cap = _vmem_capacity_bytes()
    vmem_limit = (3 * cap) // 4
    budget = (2 * cap) // 3
    Bb = _pick_batch_block(B, tq, tk, Hp, C, budget)

    # Fused, lane-padded (q | k | v) projection weight in bf16 for the MXU.
    w = jnp.zeros((C, 3 * Hp), dtype=jnp.bfloat16)
    w = w.at[:, 0:H].set(wq.astype(jnp.bfloat16))
    w = w.at[:, Hp:Hp + H].set(wk.astype(jnp.bfloat16))
    w = w.at[:, 2 * Hp:2 * Hp + H].set(wv.astype(jnp.bfloat16))

    xb = x.astype(jnp.bfloat16)

    try:
        call = _make_call(B, T, C, Hp, Bb, tq, tk, x.dtype, scale, vmem_limit,
                          single_buffer_w=True)
        out_p = jax.block_until_ready(call(xb, xb, w))
    except Exception:
        # Fallback if this jax build rejects pl.Buffered(1) on a BlockSpec.
        call = _make_call(B, T, C, Hp, Bb, tq, tk, x.dtype, scale, vmem_limit,
                          single_buffer_w=False)
        out_p = jax.block_until_ready(call(xb, xb, w))

    # Strip the lane padding of the head dimension.
    return out_p[..., :H]


def head_reference(x, wk, wq, wv):
    """Pure-JAX f32 reference matching the PyTorch forward (eval mode)."""
    k = x @ wk
    q = x @ wq
    v = x @ wv
    H = k.shape[-1]
    wei = (q @ jnp.swapaxes(k, -2, -1)) * (H ** -0.5)
    T = x.shape[1]
    tril = jnp.tril(jnp.ones((T, T), dtype=bool))
    wei = jnp.where(tril, wei, -jnp.inf)
    wei = jax.nn.softmax(wei, axis=-1)
    return wei @ v


if __name__ == "__main__":
    # CFG-equivalent small shapes: n_embd=32, context_size=8, head_size=16
    B, T, C, H = 2, 8, 32, 16

    key = jax.random.PRNGKey(0)
    kx, kk, kq, kv = jax.random.split(key, 4)
    x = jax.random.normal(kx, (B, T, C), dtype=jnp.float32)
    # deterministic Linear weights (bias=False); stored as (C, H) so forward is x @ W
    wk = jax.random.normal(kk, (C, H), dtype=jnp.float32) * (C ** -0.5)
    wq = jax.random.normal(kq, (C, H), dtype=jnp.float32) * (C ** -0.5)
    wv = jax.random.normal(kv, (C, H), dtype=jnp.float32) * (C ** -0.5)

    out = head_forward(x, wk, wq, wv)
    out = jax.block_until_ready(out)

    ref = head_reference(x, wk, wq, wv)
    assert out.shape == (B, T, H)
    # bf16 MXU operands + approximate reciprocal -> loosened tolerance vs f32 ref.
    assert jnp.allclose(out, ref, atol=5e-2, rtol=5e-2), "mismatch vs reference"

    print("KERNEL_OK")
</pallas_src>

<mosaic_0001>
module attributes {stable_mosaic.version = 11 : i64} {
  func.func @_head_flash_kernel(%arg0: i32, %arg1: i32, %arg2: i32, %arg3: memref<1x8x32xbf16, #tpu.memory_space<vmem>>, %arg4: memref<1x8x32xbf16, #tpu.memory_space<vmem>>, %arg5: memref<32x384xbf16, #tpu.memory_space<vmem>>, %arg6: memref<1x8x128xf32, #tpu.memory_space<vmem>>, %arg7: memref<1x8x128xbf16, #tpu.memory_space<vmem>>, %arg8: memref<1x8x1xf32, #tpu.memory_space<vmem>>, %arg9: memref<1x8x1xf32, #tpu.memory_space<vmem>>, %arg10: memref<1x8x128xf32, #tpu.memory_space<vmem>>) attributes {dimension_semantics = [#tpu.dimension_semantics<parallel>, #tpu.dimension_semantics<parallel>, #tpu.dimension_semantics<arbitrary>], iteration_bounds = array<i64: 2, 1, 1>, scalar_prefetch = 0 : i64, scratch_operands = 4 : i64, tpu.core_type = #tpu.core_type<tc>, window_params = [{transform_indices = @transform_0, window_bounds = array<i64: 1, 8, 32>}, {transform_indices = @transform_1, window_bounds = array<i64: 1, 8, 32>}, {pipeline_mode = #tpu.pipeline_mode<synchronous>, transform_indices = @transform_2, window_bounds = array<i64: 32, 384>}, {transform_indices = @transform_3, window_bounds = array<i64: 1, 8, 128>}]} {
    %c0_i32 = arith.constant 0 : i32
    %0 = arith.cmpi eq, %arg2, %c0_i32 : i32
    %1 = arith.extui %0 : i1 to i32
    %c0_i32_0 = arith.constant 0 : i32
    %2 = arith.cmpi ne, %1, %c0_i32_0 : i32
    scf.if %2 {
      %c0 = arith.constant 0 : index
      %c0_5 = arith.constant 0 : index
      %c0_6 = arith.constant 0 : index
      %12 = vector.load %arg3[%c0, %c0_5, %c0_6] : memref<1x8x32xbf16, #tpu.memory_space<vmem>>, vector<1x8x32xbf16>
      %c0_7 = arith.constant 0 : index
      %c0_8 = arith.constant 0 : index
      %13 = vector.load %arg5[%c0_7, %c0_8] : memref<32x384xbf16, #tpu.memory_space<vmem>>, vector<32x128xbf16>
      %cst = arith.constant dense<0.000000e+00> : vector<1x8x128xf32>
      %14 = tpu.matmul %12, %13, %cst {dimension_numbers = #tpu.dot_dimension_numbers<[2], [0], [0, 1], [1], [0, 0, 0, 1, 1, 1], [], []>} : vector<1x8x32xbf16>, vector<32x128xbf16>, vector<1x8x128xf32> -> vector<1x8x128xf32>
      %cst_9 = arith.constant 2.500000e-01 : f32
      %15 = vector.broadcast %cst_9 : f32 to vector<1x8x128xf32>
      %16 = arith.mulf %14, %15 : vector<1x8x128xf32>
      %17 = arith.truncf %16 : vector<1x8x128xf32> to vector<1x8x128xbf16>
      %c0_10 = arith.constant 0 : index
      %c0_11 = arith.constant 0 : index
      %c0_12 = arith.constant 0 : index
      %18 = vector.load %arg7[%c0_10, %c0_11, %c0_12] : memref<1x8x128xbf16, #tpu.memory_space<vmem>>, vector<1x8x128xbf16>
      tpu.vector_store %arg7[%c0_10, %c0_11, %c0_12], %17 {strides = array<i32>} : memref<1x8x128xbf16, #tpu.memory_space<vmem>>, vector<1x8x128xbf16>,
      %cst_13 = arith.constant 0xFF800000 : f32
      %19 = vector.broadcast %cst_13 : f32 to vector<1x8x1xf32>
      %c0_14 = arith.constant 0 : index
      %c0_15 = arith.constant 0 : index
      %c0_16 = arith.constant 0 : index
      %20 = vector.load %arg8[%c0_14, %c0_15, %c0_16] : memref<1x8x1xf32, #tpu.memory_space<vmem>>, vector<1x8x1xf32>
      tpu.vector_store %arg8[%c0_14, %c0_15, %c0_16], %19 {strides = array<i32>} : memref<1x8x1xf32, #tpu.memory_space<vmem>>, vector<1x8x1xf32>,
      %cst_17 = arith.constant 0.000000e+00 : f32
      %21 = vector.broadcast %cst_17 : f32 to vector<1x8x1xf32>
      %c0_18 = arith.constant 0 : index
      %c0_19 = arith.constant 0 : index
      %c0_20 = arith.constant 0 : index
      %22 = vector.load %arg9[%c0_18, %c0_19, %c0_20] : memref<1x8x1xf32, #tpu.memory_space<vmem>>, vector<1x8x1xf32>
      tpu.vector_store %arg9[%c0_18, %c0_19, %c0_20], %21 {strides = array<i32>} : memref<1x8x1xf32, #tpu.memory_space<vmem>>, vector<1x8x1xf32>,
      %cst_21 = arith.constant 0.000000e+00 : f32
      %23 = vector.broadcast %cst_21 : f32 to vector<1x8x128xf32>
      %c0_22 = arith.constant 0 : index
      %c0_23 = arith.constant 0 : index
      %c0_24 = arith.constant 0 : index
      %24 = vector.load %arg10[%c0_22, %c0_23, %c0_24] : memref<1x8x128xf32, #tpu.memory_space<vmem>>, vector<1x8x128xf32>
      tpu.vector_store %arg10[%c0_22, %c0_23, %c0_24], %23 {strides = array<i32>} : memref<1x8x128xf32, #tpu.memory_space<vmem>>, vector<1x8x128xf32>,
    } else {
    }
    %c8_i32 = arith.constant 8 : i32
    %3 = arith.muli %arg2, %c8_i32 : i32
    %c8_i32_1 = arith.constant 8 : i32
    %4 = arith.muli %arg1, %c8_i32_1 : i32
    %c7_i32 = arith.constant 7 : i32
    %5 = arith.addi %4, %c7_i32 : i32
    %6 = arith.cmpi sle, %3, %5 : i32
    %7 = arith.extui %6 : i1 to i32
    %c0_i32_2 = arith.constant 0 : i32
    %8 = arith.cmpi ne, %7, %c0_i32_2 : i32
    scf.if %8 {
      %c0 = arith.constant 0 : index
      %c0_5 = arith.constant 0 : index
      %c0_6 = arith.constant 0 : index
      %12 = vector.load %arg4[%c0, %c0_5, %c0_6] : memref<1x8x32xbf16, #tpu.memory_space<vmem>>, vector<1x8x32xbf16>
      %c0_7 = arith.constant 0 : index
      %c128 = arith.constant 128 : index
      %13 = vector.load %arg5[%c0_7, %c128] : memref<32x384xbf16, #tpu.memory_space<vmem>>, vector<32x256xbf16>
      %cst = arith.constant dense<0.000000e+00> : vector<1x8x256xf32>
      %14 = tpu.matmul %12, %13, %cst {dimension_numbers = #tpu.dot_dimension_numbers<[2], [0], [0, 1], [1], [0, 0, 0, 1, 1, 1], [], []>} : vector<1x8x32xbf16>, vector<32x256xbf16>, vector<1x8x256xf32> -> vector<1x8x256xf32>
      %15 = vector.extract_strided_slice %14 {offsets = [0, 0, 0], sizes = [1, 8, 128], strides = [1, 1, 1]} : vector<1x8x256xf32> to vector<1x8x128xf32>
      %16 = arith.truncf %15 : vector<1x8x128xf32> to vector<1x8x128xbf16>
      %17 = vector.extract_strided_slice %14 {offsets = [0, 0, 128], sizes = [1, 8, 128], strides = [1, 1, 1]} : vector<1x8x256xf32> to vector<1x8x128xf32>
      %18 = arith.truncf %17 : vector<1x8x128xf32> to vector<1x8x128xbf16>
      %c0_8 = arith.constant 0 : index
      %c0_9 = arith.constant 0 : index
      %c0_10 = arith.constant 0 : index
      %19 = vector.load %arg7[%c0_8, %c0_9, %c0_10] : memref<1x8x128xbf16, #tpu.memory_space<vmem>>, vector<1x8x128xbf16>
      %cst_11 = arith.constant dense<0.000000e+00> : vector<1x8x8xf32>
      %20 = tpu.matmul %19, %16, %cst_11 {dimension_numbers = #tpu.dot_dimension_numbers<[2], [2], [1], [1], [0, 0, 0, 1, 1, 1], [0], [0]>} : vector<1x8x128xbf16>, vector<1x8x128xbf16>, vector<1x8x8xf32> -> vector<1x8x8xf32>
      %21 = tpu.iota {dimensions = array<i32: 1>} : vector<8x8xi32>
      %22 = tpu.iota {dimensions = array<i32: 0>} : vector<8x8xi32>
      %23 = arith.subi %21, %22 : vector<8x8xi32>
      %c8_i32_12 = arith.constant 8 : i32
      %24 = arith.muli %arg1, %c8_i32_12 : i32
      %c8_i32_13 = arith.constant 8 : i32
      %25 = arith.muli %arg2, %c8_i32_13 : i32
      %26 = arith.subi %24, %25 : i32
      %27 = vector.broadcast %26 : i32 to vector<8x8xi32>
      %28 = arith.cmpi sle, %23, %27 : vector<8x8xi32>
      %29 = vector.shape_cast %28 : vector<8x8xi1> to vector<1x8x8xi1>
      %cst_14 = arith.constant 0xFF800000 : f32
      %30 = vector.broadcast %cst_14 : f32 to vector<1x8x8xf32>
      %31 = arith.select %29, %20, %30 : vector<1x8x8xi1>, vector<1x8x8xf32>
      %c0_15 = arith.constant 0 : index
      %c0_16 = arith.constant 0 : index
      %c0_17 = arith.constant 0 : index
      %32 = vector.load %arg8[%c0_15, %c0_16, %c0_17] : memref<1x8x1xf32, #tpu.memory_space<vmem>>, vector<1x8x1xf32>
      %cst_18 = arith.constant dense<0xFF800000> : vector<1x8xf32>
      %33 = vector.multi_reduction <maximumf>, %31, %cst_18 [2] : vector<1x8x8xf32> to vector<1x8xf32>
      %34 = vector.shape_cast %33 : vector<1x8xf32> to vector<1x8x1xf32>
      %35 = arith.maximumf %32, %34 : vector<1x8x1xf32>
      %36 = arith.subf %32, %35 : vector<1x8x1xf32>
      %37 = math.exp %36 : vector<1x8x1xf32>
      %38 = vector.broadcast %35 : vector<1x8x1xf32> to vector<1x8x8xf32>
      %39 = arith.subf %31, %38 : vector<1x8x8xf32>
      %40 = math.exp %39 : vector<1x8x8xf32>
      %c0_19 = arith.constant 0 : index
      %c0_20 = arith.constant 0 : index
      %c0_21 = arith.constant 0 : index
      %41 = vector.load %arg9[%c0_19, %c0_20, %c0_21] : memref<1x8x1xf32, #tpu.memory_space<vmem>>, vector<1x8x1xf32>
      %42 = arith.mulf %37, %41 : vector<1x8x1xf32>
      %cst_22 = arith.constant dense<0.000000e+00> : vector<1x8xf32>
      %43 = vector.multi_reduction <add>, %40, %cst_22 [2] : vector<1x8x8xf32> to vector<1x8xf32>
      %44 = vector.shape_cast %43 : vector<1x8xf32> to vector<1x8x1xf32>
      %45 = arith.addf %42, %44 : vector<1x8x1xf32>
      %c0_23 = arith.constant 0 : index
      %c0_24 = arith.constant 0 : index
      %c0_25 = arith.constant 0 : index
      %46 = vector.load %arg9[%c0_23, %c0_24, %c0_25] : memref<1x8x1xf32, #tpu.memory_space<vmem>>, vector<1x8x1xf32>
      tpu.vector_store %arg9[%c0_23, %c0_24, %c0_25], %45 {strides = array<i32>} : memref<1x8x1xf32, #tpu.memory_space<vmem>>, vector<1x8x1xf32>,
      %47 = arith.truncf %40 : vector<1x8x8xf32> to vector<1x8x8xbf16>
      %cst_26 = arith.constant dense<0.000000e+00> : vector<1x8x128xf32>
      %48 = tpu.matmul %47, %18, %cst_26 {dimension_numbers = #tpu.dot_dimension_numbers<[2], [1], [1], [2], [0, 0, 0, 1, 1, 2], [0], [0]>} : vector<1x8x8xbf16>, vector<1x8x128xbf16>, vector<1x8x128xf32> -> vector<1x8x128xf32>
      %c0_27 = arith.constant 0 : index
      %c0_28 = arith.constant 0 : index
      %c0_29 = arith.constant 0 : index
      %49 = vector.load %arg10[%c0_27, %c0_28, %c0_29] : memref<1x8x128xf32, #tpu.memory_space<vmem>>, vector<1x8x128xf32>
      %50 = vector.broadcast %37 : vector<1x8x1xf32> to vector<1x8x128xf32>
      %51 = arith.mulf %50, %49 : vector<1x8x128xf32>
      %52 = arith.addf %51, %48 : vector<1x8x128xf32>
      %c0_30 = arith.constant 0 : index
      %c0_31 = arith.constant 0 : index
      %c0_32 = arith.constant 0 : index
      %53 = vector.load %arg10[%c0_30, %c0_31, %c0_32] : memref<1x8x128xf32, #tpu.memory_space<vmem>>, vector<1x8x128xf32>
      tpu.vector_store %arg10[%c0_30, %c0_31, %c0_32], %52 {strides = array<i32>} : memref<1x8x128xf32, #tpu.memory_space<vmem>>, vector<1x8x128xf32>,
      %c0_33 = arith.constant 0 : index
      %c0_34 = arith.constant 0 : index
      %c0_35 = arith.constant 0 : index
      %54 = vector.load %arg8[%c0_33, %c0_34, %c0_35] : memref<1x8x1xf32, #tpu.memory_space<vmem>>, vector<1x8x1xf32>
      tpu.vector_store %arg8[%c0_33, %c0_34, %c0_35], %35 {strides = array<i32>} : memref<1x8x1xf32, #tpu.memory_space<vmem>>, vector<1x8x1xf32>,
    } else {
    }
    %c0_i32_3 = arith.constant 0 : i32
    %9 = arith.cmpi eq, %arg2, %c0_i32_3 : i32
    %10 = arith.extui %9 : i1 to i32
    %c0_i32_4 = arith.constant 0 : i32
    %11 = arith.cmpi ne, %10, %c0_i32_4 : i32
    scf.if %11 {
      %c0 = arith.constant 0 : index
      %c0_5 = arith.constant 0 : index
      %c0_6 = arith.constant 0 : index
      %12 = vector.load %arg9[%c0, %c0_5, %c0_6] : memref<1x8x1xf32, #tpu.memory_space<vmem>>, vector<1x8x1xf32>
      %13 = tpu.reciprocal %12 {approx = true} : vector<1x8x1xf32> -> vector<1x8x1xf32>
      %c0_7 = arith.constant 0 : index
      %c0_8 = arith.constant 0 : index
      %c0_9 = arith.constant 0 : index
      %14 = vector.load %arg10[%c0_7, %c0_8, %c0_9] : memref<1x8x128xf32, #tpu.memory_space<vmem>>, vector<1x8x128xf32>
      %15 = vector.broadcast %13 : vector<1x8x1xf32> to vector<1x8x128xf32>
      %16 = arith.mulf %14, %15 : vector<1x8x128xf32>
      %c0_10 = arith.constant 0 : index
      %c0_11 = arith.constant 0 : index
      %c0_12 = arith.constant 0 : index
      %17 = vector.load %arg6[%c0_10, %c0_11, %c0_12] : memref<1x8x128xf32, #tpu.memory_space<vmem>>, vector<1x8x128xf32>
      tpu.vector_store %arg6[%c0_10, %c0_11, %c0_12], %16 {strides = array<i32>} : memref<1x8x128xf32, #tpu.memory_space<vmem>>, vector<1x8x128xf32>,
    } else {
    }
    return
  }
  func.func @transform_0(%arg0: i32, %arg1: i32, %arg2: i32) -> (i32, i32, i32) {
    %c0_i32 = arith.constant 0 : i32
    %c0_i32_0 = arith.constant 0 : i32
    return %arg0, %arg1, %c0_i32 : i32, i32, i32
  }
  func.func @transform_1(%arg0: i32, %arg1: i32, %arg2: i32) -> (i32, i32, i32) {
    %c0_i32 = arith.constant 0 : i32
    %c0_i32_0 = arith.constant 0 : i32
    return %arg0, %arg2, %c0_i32 : i32, i32, i32
  }
  func.func @transform_2(%arg0: i32, %arg1: i32, %arg2: i32) -> (i32, i32) {
    %c0_i32 = arith.constant 0 : i32
    %c0_i32_0 = arith.constant 0 : i32
    %c0_i32_1 = arith.constant 0 : i32
    return %c0_i32, %c0_i32_0 : i32, i32
  }
  func.func @transform_3(%arg0: i32, %arg1: i32, %arg2: i32) -> (i32, i32, i32) {
    %c0_i32 = arith.constant 0 : i32
    %c0_i32_0 = arith.constant 0 : i32
    return %arg0, %arg1, %c0_i32 : i32, i32, i32
  }
}

module attributes {stable_mosaic.version = 11 : i64} {
  func.func @_head_flash_kernel(%arg0: i32, %arg1: i32, %arg2: i32, %arg3: memref<1x8x32xbf16, #tpu.memory_space<vmem>>, %arg4: memref<1x8x32xbf16, #tpu.memory_space<vmem>>, %arg5: memref<32x384xbf16, #tpu.memory_space<vmem>>, %arg6: memref<1x8x128xf32, #tpu.memory_space<vmem>>, %arg7: memref<1x8x128xbf16, #tpu.memory_space<vmem>>, %arg8: memref<1x8x1xf32, #tpu.memory_space<vmem>>, %arg9: memref<1x8x1xf32, #tpu.memory_space<vmem>>, %arg10: memref<1x8x128xf32, #tpu.memory_space<vmem>>) attributes {dimension_semantics = [#tpu.dimension_semantics<parallel>, #tpu.dimension_semantics<parallel>, #tpu.dimension_semantics<arbitrary>], iteration_bounds = array<i64: 2, 1, 1>, scalar_prefetch = 0 : i64, scratch_operands = 4 : i64, tpu.core_type = #tpu.core_type<tc>, window_params = [{transform_indices = @transform_0, window_bounds = array<i64: 1, 8, 32>}, {transform_indices = @transform_1, window_bounds = array<i64: 1, 8, 32>}, {pipeline_mode = #tpu.pipeline_mode<synchronous>, transform_indices = @transform_2, window_bounds = array<i64: 32, 384>}, {transform_indices = @transform_3, window_bounds = array<i64: 1, 8, 128>}]} {
    %c0_i32 = arith.constant 0 : i32
    %0 = arith.cmpi eq, %arg2, %c0_i32 : i32
    %1 = arith.extui %0 : i1 to i32
    %c0_i32_0 = arith.constant 0 : i32
    %2 = arith.cmpi ne, %1, %c0_i32_0 : i32
    scf.if %2 {
      %c0 = arith.constant 0 : index
      %c0_5 = arith.constant 0 : index
      %c0_6 = arith.constant 0 : index
      %12 = vector.load %arg3[%c0, %c0_5, %c0_6] : memref<1x8x32xbf16, #tpu.memory_space<vmem>>, vector<1x8x32xbf16>
      %c0_7 = arith.constant 0 : index
      %c0_8 = arith.constant 0 : index
      %13 = vector.load %arg5[%c0_7, %c0_8] : memref<32x384xbf16, #tpu.memory_space<vmem>>, vector<32x128xbf16>
      %cst = arith.constant dense<0.000000e+00> : vector<1x8x128xf32>
      %14 = tpu.matmul %12, %13, %cst {dimension_numbers = #tpu.dot_dimension_numbers<[2], [0], [0, 1], [1], [0, 0, 0, 1, 1, 1], [], []>} : vector<1x8x32xbf16>, vector<32x128xbf16>, vector<1x8x128xf32> -> vector<1x8x128xf32>
      %cst_9 = arith.constant 2.500000e-01 : f32
      %15 = vector.broadcast %cst_9 : f32 to vector<1x8x128xf32>
      %16 = arith.mulf %14, %15 : vector<1x8x128xf32>
      %17 = arith.truncf %16 : vector<1x8x128xf32> to vector<1x8x128xbf16>
      %c0_10 = arith.constant 0 : index
      %c0_11 = arith.constant 0 : index
      %c0_12 = arith.constant 0 : index
      %18 = vector.load %arg7[%c0_10, %c0_11, %c0_12] : memref<1x8x128xbf16, #tpu.memory_space<vmem>>, vector<1x8x128xbf16>
      tpu.vector_store %arg7[%c0_10, %c0_11, %c0_12], %17 {strides = array<i32>} : memref<1x8x128xbf16, #tpu.memory_space<vmem>>, vector<1x8x128xbf16>,
      %cst_13 = arith.constant 0xFF800000 : f32
      %19 = vector.broadcast %cst_13 : f32 to vector<1x8x1xf32>
      %c0_14 = arith.constant 0 : index
      %c0_15 = arith.constant 0 : index
      %c0_16 = arith.constant 0 : index
      %20 = vector.load %arg8[%c0_14, %c0_15, %c0_16] : memref<1x8x1xf32, #tpu.memory_space<vmem>>, vector<1x8x1xf32>
      tpu.vector_store %arg8[%c0_14, %c0_15, %c0_16], %19 {strides = array<i32>} : memref<1x8x1xf32, #tpu.memory_space<vmem>>, vector<1x8x1xf32>,
      %cst_17 = arith.constant 0.000000e+00 : f32
      %21 = vector.broadcast %cst_17 : f32 to vector<1x8x1xf32>
      %c0_18 = arith.constant 0 : index
      %c0_19 = arith.constant 0 : index
      %c0_20 = arith.constant 0 : index
      %22 = vector.load %arg9[%c0_18, %c0_19, %c0_20] : memref<1x8x1xf32, #tpu.memory_space<vmem>>, vector<1x8x1xf32>
      tpu.vector_store %arg9[%c0_18, %c0_19, %c0_20], %21 {strides = array<i32>} : memref<1x8x1xf32, #tpu.memory_space<vmem>>, vector<1x8x1xf32>,
      %cst_21 = arith.constant 0.000000e+00 : f32
      %23 = vector.broadcast %cst_21 : f32 to vector<1x8x128xf32>
      %c0_22 = arith.constant 0 : index
      %c0_23 = arith.constant 0 : index
      %c0_24 = arith.constant 0 : index
      %24 = vector.load %arg10[%c0_22, %c0_23, %c0_24] : memref<1x8x128xf32, #tpu.memory_space<vmem>>, vector<1x8x128xf32>
      tpu.vector_store %arg10[%c0_22, %c0_23, %c0_24], %23 {strides = array<i32>} : memref<1x8x128xf32, #tpu.memory_space<vmem>>, vector<1x8x128xf32>,
    } else {
    }
    %c8_i32 = arith.constant 8 : i32
    %3 = arith.muli %arg2, %c8_i32 : i32
    %c8_i32_1 = arith.constant 8 : i32
    %4 = arith.muli %arg1, %c8_i32_1 : i32
    %c7_i32 = arith.constant 7 : i32
    %5 = arith.addi %4, %c7_i32 : i32
    %6 = arith.cmpi sle, %3, %5 : i32
    %7 = arith.extui %6 : i1 to i32
    %c0_i32_2 = arith.constant 0 : i32
    %8 = arith.cmpi ne, %7, %c0_i32_2 : i32
    scf.if %8 {
      %c0 = arith.constant 0 : index
      %c0_5 = arith.constant 0 : index
      %c0_6 = arith.constant 0 : index
      %12 = vector.load %arg4[%c0, %c0_5, %c0_6] : memref<1x8x32xbf16, #tpu.memory_space<vmem>>, vector<1x8x32xbf16>
      %c0_7 = arith.constant 0 : index
      %c128 = arith.constant 128 : index
      %13 = vector.load %arg5[%c0_7, %c128] : memref<32x384xbf16, #tpu.memory_space<vmem>>, vector<32x256xbf16>
      %cst = arith.constant dense<0.000000e+00> : vector<1x8x256xf32>
      %14 = tpu.matmul %12, %13, %cst {dimension_numbers = #tpu.dot_dimension_numbers<[2], [0], [0, 1], [1], [0, 0, 0, 1, 1, 1], [], []>} : vector<1x8x32xbf16>, vector<32x256xbf16>, vector<1x8x256xf32> -> vector<1x8x256xf32>
      %15 = vector.extract_strided_slice %14 {offsets = [0, 0, 0], sizes = [1, 8, 128], strides = [1, 1, 1]} : vector<1x8x256xf32> to vector<1x8x128xf32>
      %16 = arith.truncf %15 : vector<1x8x128xf32> to vector<1x8x128xbf16>
      %17 = vector.extract_strided_slice %14 {offsets = [0, 0, 128], sizes = [1, 8, 128], strides = [1, 1, 1]} : vector<1x8x256xf32> to vector<1x8x128xf32>
      %18 = arith.truncf %17 : vector<1x8x128xf32> to vector<1x8x128xbf16>
      %c0_8 = arith.constant 0 : index
      %c0_9 = arith.constant 0 : index
      %c0_10 = arith.constant 0 : index
      %19 = vector.load %arg7[%c0_8, %c0_9, %c0_10] : memref<1x8x128xbf16, #tpu.memory_space<vmem>>, vector<1x8x128xbf16>
      %cst_11 = arith.constant dense<0.000000e+00> : vector<1x8x8xf32>
      %20 = tpu.matmul %19, %16, %cst_11 {dimension_numbers = #tpu.dot_dimension_numbers<[2], [2], [1], [1], [0, 0, 0, 1, 1, 1], [0], [0]>} : vector<1x8x128xbf16>, vector<1x8x128xbf16>, vector<1x8x8xf32> -> vector<1x8x8xf32>
      %21 = tpu.iota {dimensions = array<i32: 1>} : vector<8x8xi32>
      %22 = tpu.iota {dimensions = array<i32: 0>} : vector<8x8xi32>
      %23 = arith.subi %21, %22 : vector<8x8xi32>
      %c8_i32_12 = arith.constant 8 : i32
      %24 = arith.muli %arg1, %c8_i32_12 : i32
      %c8_i32_13 = arith.constant 8 : i32
      %25 = arith.muli %arg2, %c8_i32_13 : i32
      %26 = arith.subi %24, %25 : i32
      %27 = vector.broadcast %26 : i32 to vector<8x8xi32>
      %28 = arith.cmpi sle, %23, %27 : vector<8x8xi32>
      %29 = vector.shape_cast %28 : vector<8x8xi1> to vector<1x8x8xi1>
      %cst_14 = arith.constant 0xFF800000 : f32
      %30 = vector.broadcast %cst_14 : f32 to vector<1x8x8xf32>
      %31 = arith.select %29, %20, %30 : vector<1x8x8xi1>, vector<1x8x8xf32>
      %c0_15 = arith.constant 0 : index
      %c0_16 = arith.constant 0 : index
      %c0_17 = arith.constant 0 : index
      %32 = vector.load %arg8[%c0_15, %c0_16, %c0_17] : memref<1x8x1xf32, #tpu.memory_space<vmem>>, vector<1x8x1xf32>
      %cst_18 = arith.constant dense<0xFF800000> : vector<1x8xf32>
      %33 = vector.multi_reduction <maximumf>, %31, %cst_18 [2] : vector<1x8x8xf32> to vector<1x8xf32>
      %34 = vector.shape_cast %33 : vector<1x8xf32> to vector<1x8x1xf32>
      %35 = arith.maximumf %32, %34 : vector<1x8x1xf32>
      %36 = arith.subf %32, %35 : vector<1x8x1xf32>
      %37 = math.exp %36 : vector<1x8x1xf32>
      %38 = vector.broadcast %35 : vector<1x8x1xf32> to vector<1x8x8xf32>
      %39 = arith.subf %31, %38 : vector<1x8x8xf32>
      %40 = math.exp %39 : vector<1x8x8xf32>
      %c0_19 = arith.constant 0 : index
      %c0_20 = arith.constant 0 : index
      %c0_21 = arith.constant 0 : index
      %41 = vector.load %arg9[%c0_19, %c0_20, %c0_21] : memref<1x8x1xf32, #tpu.memory_space<vmem>>, vector<1x8x1xf32>
      %42 = arith.mulf %37, %41 : vector<1x8x1xf32>
      %cst_22 = arith.constant dense<0.000000e+00> : vector<1x8xf32>
      %43 = vector.multi_reduction <add>, %40, %cst_22 [2] : vector<1x8x8xf32> to vector<1x8xf32>
      %44 = vector.shape_cast %43 : vector<1x8xf32> to vector<1x8x1xf32>
      %45 = arith.addf %42, %44 : vector<1x8x1xf32>
      %c0_23 = arith.constant 0 : index
      %c0_24 = arith.constant 0 : index
      %c0_25 = arith.constant 0 : index
      %46 = vector.load %arg9[%c0_23, %c0_24, %c0_25] : memref<1x8x1xf32, #tpu.memory_space<vmem>>, vector<1x8x1xf32>
      tpu.vector_store %arg9[%c0_23, %c0_24, %c0_25], %45 {strides = array<i32>} : memref<1x8x1xf32, #tpu.memory_space<vmem>>, vector<1x8x1xf32>,
      %47 = arith.truncf %40 : vector<1x8x8xf32> to vector<1x8x8xbf16>
      %cst_26 = arith.constant dense<0.000000e+00> : vector<1x8x128xf32>
      %48 = tpu.matmul %47, %18, %cst_26 {dimension_numbers = #tpu.dot_dimension_numbers<[2], [1], [1], [2], [0, 0, 0, 1, 1, 2], [0], [0]>} : vector<1x8x8xbf16>, vector<1x8x128xbf16>, vector<1x8x128xf32> -> vector<1x8x128xf32>
      %c0_27 = arith.constant 0 : index
      %c0_28 = arith.constant 0 : index
      %c0_29 = arith.constant 0 : index
      %49 = vector.load %arg10[%c0_27, %c0_28, %c0_29] : memref<1x8x128xf32, #tpu.memory_space<vmem>>, vector<1x8x128xf32>
      %50 = vector.broadcast %37 : vector<1x8x1xf32> to vector<1x8x128xf32>
      %51 = arith.mulf %50, %49 : vector<1x8x128xf32>
      %52 = arith.addf %51, %48 : vector<1x8x128xf32>
      %c0_30 = arith.constant 0 : index
      %c0_31 = arith.constant 0 : index
      %c0_32 = arith.constant 0 : index
      %53 = vector.load %arg10[%c0_30, %c0_31, %c0_32] : memref<1x8x128xf32, #tpu.memory_space<vmem>>, vector<1x8x128xf32>
      tpu.vector_store %arg10[%c0_30, %c0_31, %c0_32], %52 {strides = array<i32>} : memref<1x8x128xf32, #tpu.memory_space<vmem>>, vector<1x8x128xf32>,
      %c0_33 = arith.constant 0 : index
      %c0_34 = arith.constant 0 : index
      %c0_35 = arith.constant 0 : index
      %54 = vector.load %arg8[%c0_33, %c0_34, %c0_35] : memref<1x8x1xf32, #tpu.memory_space<vmem>>, vector<1x8x1xf32>
      tpu.vector_store %arg8[%c0_33, %c0_34, %c0_35], %35 {strides = array<i32>} : memref<1x8x1xf32, #tpu.memory_space<vmem>>, vector<1x8x1xf32>,
    } else {
    }
    %c0_i32_3 = arith.constant 0 : i32
    %9 = arith.cmpi eq, %arg2, %c0_i32_3 : i32
    %10 = arith.extui %9 : i1 to i32
    %c0_i32_4 = arith.constant 0 : i32
    %11 = arith.cmpi ne, %10, %c0_i32_4 : i32
    scf.if %11 {
      %c0 = arith.constant 0 : index
      %c0_5 = arith.constant 0 : index
      %c0_6 = arith.constant 0 : index
      %12 = vector.load %arg9[%c0, %c0_5, %c0_6] : memref<1x8x1xf32, #tpu.memory_space<vmem>>, vector<1x8x1xf32>
      %13 = tpu.reciprocal %12 {approx = true} : vector<1x8x1xf32> -> vector<1x8x1xf32>
      %c0_7 = arith.constant 0 : index
      %c0_8 = arith.constant 0 : index
      %c0_9 = arith.constant 0 : index
      %14 = vector.load %arg10[%c0_7, %c0_8, %c0_9] : memref<1x8x128xf32, #tpu.memory_space<vmem>>, vector<1x8x128xf32>
      %15 = vector.broadcast %13 : vector<1x8x1xf32> to vector<1x8x128xf32>
      %16 = arith.mulf %14, %15 : vector<1x8x128xf32>
      %c0_10 = arith.constant 0 : index
      %c0_11 = arith.constant 0 : index
      %c0_12 = arith.constant 0 : index
      %17 = vector.load %arg6[%c0_10, %c0_11, %c0_12] : memref<1x8x128xf32, #tpu.memory_space<vmem>>, vector<1x8x128xf32>
      tpu.vector_store %arg6[%c0_10, %c0_11, %c0_12], %16 {strides = array<i32>} : memref<1x8x128xf32, #tpu.memory_space<vmem>>, vector<1x8x128xf32>,
    } else {
    }
    return
  }
  func.func @transform_0(%arg0: i32, %arg1: i32, %arg2: i32) -> (i32, i32, i32) {
    %c0_i32 = arith.constant 0 : i32
    %c0_i32_0 = arith.constant 0 : i32
    return %arg0, %arg1, %c0_i32 : i32, i32, i32
  }
  func.func @transform_1(%arg0: i32, %arg1: i32, %arg2: i32) -> (i32, i32, i32) {
    %c0_i32 = arith.constant 0 : i32
    %c0_i32_0 = arith.constant 0 : i32
    return %arg0, %arg2, %c0_i32 : i32, i32, i32
  }
  func.func @transform_2(%arg0: i32, %arg1: i32, %arg2: i32) -> (i32, i32) {
    %c0_i32 = arith.constant 0 : i32
    %c0_i32_0 = arith.constant 0 : i32
    %c0_i32_1 = arith.constant 0 : i32
    return %c0_i32, %c0_i32_0 : i32, i32
  }
  func.func @transform_3(%arg0: i32, %arg1: i32, %arg2: i32) -> (i32, i32, i32) {
    %c0_i32 = arith.constant 0 : i32
    %c0_i32_0 = arith.constant 0 : i32
    return %arg0, %arg1, %c0_i32 : i32, i32, i32
  }
}

</mosaic_0001>

<bundles_post_ra>
// kernel: tpu_custom_call.1
= control target key start
LH: loop header
LB: loop body
LE: loop exit
PB: predicated region body
PF: predicated region fallthrough
CT: control target
= control target key end

     0   :  { %s1243_s0 = inlined_call_operand.hbm [shape: bf16[2,8,32], index: 0, kind: input, shape index: {}]   ;;  %s1244_s1 = inlined_call_operand.hbm [shape: bf16[2,8,32], index: 1, kind: input, shape index: {}]   ;;  %s1245_s2 = inlined_call_operand.hbm [shape: bf16[32,384], index: 2, kind: input, shape index: {}]   ;;  %s1246_s3 = inlined_call_operand.hbm [shape: f32[2,8,128], index: 3, kind: output, shape index: {}]  }
   0x1   :  { %1247 = sst [smem:[#allocation17_spill]] %s1245_s2 }
   0x2   :  { %8 = vsyncpa [#allocation7], 0 }
   0x3   :  { %10 = vsyncpa [#allocation7 + $0x1], 0 }
   0x4   :  { %11 = vsyncpa [#allocation10], 0 }
   0x5   :  { %13 = vsyncpa [#allocation10 + $0x1], 0 }
   0x6   :  { %14 = vsyncpa [#allocation8], 0 }
   0x7   :  { %16 = vsyncpa [#allocation8 + $0x1], 0  ;;  %s1049_s12 = smov 0   ;;  %s1051_s13 = smov 0  }
   0x8   :  { %s1053_s14 = smov 0   ;;  %s1055_s15 = smov 0  }
   0x9   :  { %s1057_s16 = smov 0   ;;  %s1059_s17 = smov 0  }
   0xa LB: > { %s1080_s18 = sadd.s32 4294967295, %s1017_s17   ;;  %s694_s19 = sadd.s32 4294967294, %s1017_s17   ;;  %s1017_s17 = sphi %s1059_s17, %s22_s17   ;;  %s1013_s16 = sphi %s1057_s16, %s1263_s16   ;;  %s1009_s15 = sphi %s1055_s15, %s1262_s15   ;;  %s1005_s14 = sphi %s1053_s14, %s1261_s14   ;;  %s1001_s13 = sphi %s1051_s13, %s1260_s13   ;;  %s997_s12 = sphi %s1049_s12, %s1259_s12  }
   0xb   : > { %p63_p0 = scmp.ne.s32.totalorder %s1001_s13, %s997_s12  ;;  %p64_p1 = scmp.eq.s32.totalorder %s1080_s18, 0 }
   0xc   : > { %p144_p3 = scmp.eq.s32.totalorder %s694_s19, 1  ;;  %p695_p5 = scmp.ge.s32.totalorder %s1017_s17, 1 }
   0xd   : > { %p1089_p4 = por %p64_p1, %p63_p0  ;;  %p151_p7 = scmp.lt.s32.totalorder %s1017_s17, 3 }
   0xe   : > { %p1094_p6 = por %p144_p3, %p63_p0  ;;  %s1019_s23 = smov [#allocation11]  }
   0xf   : > { %p1099_p8 = pnand %p695_p5, %p151_p7  ;;  %s163_s24 = sshll.u32 %s1019_s23, 4  ;;  %s164_s24 = int_to_ptr.vmem [resolvable:$true] %s163_s24 }
  0x10   : > { %s1249_s21 = scalar_select %p1094_p6, 1, 0 }
  0x11   : > { %p757_p9 = pneg %p1099_p8  ;;  %s41_s26 = sadd.s32 1, %s1013_s16 }
  0x12   : > { %s858_s27 = scalar_lea.vmem %s164_s24, 768  ;;  %p866_p5 = scmp.lt.s32.totalorder %s164_s24, %s164_s24 }
  0x13   : > { %p1108_p11 = pnand %p757_p9, %p64_p1  ;;  %p859_p13 = scmp.ne.s32.totalorder %s164_s24, %s858_s27 }
  0x14   : > { %p867_p7 = scmp.lt.s32.totalorder %s858_s27, %s858_s27 }
  0x15   : > { %p849_p12 = pneg %p1108_p11 }
  0x16   : > { %p868_p2 = por %p867_p7, %p866_p5 }
  0x17   : > { %p861_p0 = pnand %p859_p13, %p849_p12 }
  0x19   : > { %p862_p3 = pneg %p861_p0 }
  0x1b   : > { %p869_p6 = pnand %p868_p2, %p862_p3 }
  0x1d   : > { %872 = shalt.err (!%p869_p6)
}
  0x1e   : > { %s1020_s28 = smov 192   ;;  %s1021_s29 = smov 12  }
  0x1f   : > { %s1252_s2 = sld [smem:[#allocation17_spill]]  ;;  %p43_p2 = scmp.ge.s32.totalorder %s41_s26, 2 }
  0x20   : > { %s50_s5 = sadd.s32 1, %s1005_s14  ;;  %p57_p6 = scmp.ne.s32.totalorder %s1005_s14, %s1001_s13 }
  0x21   : > { %p58_p9 = scmp.eq.s32.totalorder %s1017_s17, 0  ;;  %s1265_s26 = smov (%p43_p2, %s41_s26), 0 }
  0x22   : > { %p1254_p13 = scmp.eq.s32.totalorder %s1080_s18, 1  ;;  %s45_s8 = ssub.s32 %s1013_s16, %s1265_s26 }
  0x23   : > { %p1126_p12 = por %p58_p9, %p57_p6  ;;  %p48_p3 = scmp.eq.s32.totalorder %s45_s8, 0 }
  0x24   : > { %p1132_p0 = por %p1254_p13, %p57_p6  ;;  %s177_s9 = sand.u32 1, %s1005_s14  }
  0x25   : > { %760 = dma.hbm_to_vmem [thread:$0]  (!%p1108_p11), %s1252_s2, 768, %s164_s24, [#allocation10], %s1020_s28, %s1020_s28, %s1021_s29  }
  0x26   : > { %p773_p11 = scmp.lt.s32.totalorder %s1017_s17, 2  ;;  %s698_s10 = sshll.u32 %s177_s9, 2 }
  0x27   : > { %s1141_s11 = scalar_select %p48_p3, %s1005_s14, %s50_s5  }
  0x28   : > { %s699_s19 = sshll.u32 %s1013_s16, 6  ;;  %s181_s27 = scalar_lea.vmem [#allocation6], %s698_s10 }
  0x29   : > { %s187_s25 = scalar_lea.hbm %s1243_s0, %s699_s19  ;;  %s189_s28 = sshll.u32 %s181_s27, 4  ;;  %s190_s28 = int_to_ptr.vmem [resolvable:$true] %s189_s28 }
  0x2a   : > { %p1149_p5 = pnand %p773_p11, %p1126_p12  ;;  %s1156_s5 = scalar_lea.hbm %s1244_s1, %s699_s19 }
  0x2b   : > { %s196_s8 = sand.u32 1, %s1017_s17   ;;  %s178_s2 = scalar_lea.sflag [#allocation7], %s177_s9 }
  0x2c   : > { %p875_p7 = pneg %p1149_p5  ;;  %s886_s23 = scalar_lea.vmem %s190_s28, 64 }
  0x2d   : > { %p887_p2 = scmp.ne.s32.totalorder %s190_s28, %s886_s23  ;;  %s1022_s6 = smov [#allocation6]  }
  0x2e   : > { %s891_s24 = sshll.u32 %s1022_s6, 4  ;;  %s892_s24 = int_to_ptr.vmem [resolvable:$false] %s891_s24 }
  0x2f   : > { %p889_p6 = pnand %p887_p2, %p875_p7  ;;  %s893_s27 = scalar_lea.vmem %s892_s24, 128 }
  0x30   : > { %p894_p12 = scmp.lt.s32.totalorder %s190_s28, %s892_s24  ;;  %p895_p13 = scmp.lt.s32.totalorder %s893_s27, %s886_s23 }
  0x31   : > { %p890_p9 = pneg %p889_p6 }
  0x32   : > { %p896_p11 = por %p895_p13, %p894_p12 }
  0x34   : > { %p897_p3 = pnand %p896_p11, %p890_p9 }
  0x36   : > { %900 = shalt.err (!%p897_p3)
}
  0x37   : > { %764 = dma.hbm_to_vmem [thread:$0]  (!%p1149_p5), %s187_s25, 64, %s190_s28, %s178_s2  }
  0x38   : > { %s200_s9 = scalar_lea.vmem [#allocation9], %s698_s10  ;;  %s197_s30 = scalar_lea.sflag [#allocation10], %s196_s8 }
  0x39   : > { %s208_s19 = sshll.u32 %s200_s9, 4  ;;  %s1023_s6 = smov [#allocation9]   ;;  %s209_s19 = int_to_ptr.vmem [resolvable:$true] %s208_s19 }
  0x3a   : > { %s914_s4 = scalar_lea.vmem %s209_s19, 64  ;;  %s919_s24 = sshll.u32 %s1023_s6, 4  ;;  %s920_s24 = int_to_ptr.vmem [resolvable:$false] %s919_s24 }
  0x3b   : > { %p915_p2 = scmp.ne.s32.totalorder %s209_s19, %s914_s4  ;;  %s921_s23 = scalar_lea.vmem %s920_s24, 128 }
  0x3c   : > { %p922_p9 = scmp.lt.s32.totalorder %s209_s19, %s920_s24  ;;  %p923_p12 = scmp.lt.s32.totalorder %s921_s23, %s914_s4 }
  0x3d   : > { %p917_p6 = pnand %p915_p2, %p875_p7 }
  0x3e   : > { %p924_p13 = por %p923_p12, %p922_p9 }
  0x3f   : > { %p918_p10 = pneg %p917_p6 }
  0x41   : > { %p925_p11 = pnand %p924_p13, %p918_p10 }
  0x43   : > { %928 = shalt.err (!%p925_p11)
}
  0x44   : > { %767 = dma.hbm_to_vmem [thread:$0]  (!%p1149_p5), %s1156_s5, 64, %s209_s19, %s197_s30  }
  0x45   : > { %217 = sbr.rel (%p1099_p8) target bundleno = 1074 (0x432), region = 32  ;;  %s1175_s2 = sand.u32 (!%p1099_p8), 1, %s1001_s13  }
  0x46   : > { %s703_s10 = sshll.u32 (!%p1099_p8), %s1175_s2, 2  ;;  %s220_s25 = scalar_lea.sflag (!%p1099_p8), [#allocation7], %s1175_s2 }
  0x47   : > { %s223_s28 = scalar_lea.vmem (!%p1099_p8), [#allocation6], %s703_s10 }
  0x4a   : > { %980 = dma.done.wait (%p1089_p4), %s220_s25, 64  }
  0x4b   : > { %982 = vsyncadd (%p1089_p4), %s220_s25, 4294967232  ;;  %s228_s29 = sand.u32 1, %s1080_s18   ;;  %s232_s22 = scalar_lea.vmem [#allocation9], %s703_s10 }
  0x4c   : > { %s229_s5 = scalar_lea.sflag [#allocation10], %s228_s29 }
  0x4d   : > { %984 = dma.done.wait (%p1089_p4), %s229_s5, 64  }
  0x4e   : > { %986 = vsyncadd (%p1089_p4), %s229_s5, 4294967232 }
  0x4f   : > { %988 = dma.done.wait (%p64_p1), [#allocation10], 768  }
  0x50   : > { %990 = vsyncadd (%p64_p1), [#allocation10], 4294966528  ;;  %v1024_v0 = vmov 0.0   ;;  %vm1025_vm0 = vmmov 0   ;;  %v1026_v1 = vmov 0   ;;  %vm286_vm1 = vcmask 261120  }
  0x51   : > { %727 = vmatprep.subr.bf16.mxu0 %v1024_v0  ;;  %731 = vmatprep.mubr.msk.bf16.mxu0 %vm1025_vm0, %v1024_v0  ;;  %v833_v2 = vld [vmem:[#allocation11 + $0x18] ss:$12 sps:$4 sm:$0xff]   ;;  %v834_v3 = vld [vmem:[#allocation11 + $0x20] ss:$12 sps:$4 sm:$0xff]   ;;  %v836_v4 = vld [vmem:[#allocation11 + $0x1c] ss:$12 sps:$4 sm:$0xff]   ;;  %v457_v25 = vlaneseq }
  0x52   : > { %405 = vmatprep.mubr.bf16.mxu1 %v1026_v1  ;;  %831 = vset.pattern.permute.xlu0 %v1026_v1  ;;  %v837_v5 = vld [vmem:[#allocation11] ss:$12 sps:$4 sm:$0xff]   ;;  %v838_v6 = vld [vmem:[#allocation11 + $0x8] ss:$12 sps:$4 sm:$0xff]   ;;  %v840_v7 = vld [vmem:[#allocation11 + $0x4] ss:$12 sps:$4 sm:$0xff]  }
  0x53   : > { %832 = vset.pattern.permute.xlu1 %v1026_v1  ;;  %728 = vmatpush3.bf16.msra.mxu0 %v833_v2  ;;  %v269_v8 = vld [vmem:[%s223_s28] sm:$0xf]  ;;  %v344_v9 = vld [vmem:[%s232_s22] sm:$0xf]  ;;  %vm495_vm2 = vcmask 1043456   ;;  %vm333_vm3 = vcmask 7168  }
  0x54   : > { %385 = vmatprep.subr.bf16.mxu1 %v834_v3  ;;  %729 = vmatprep.subr.bf16.mxu0 %v1024_v0  ;;  %v1027_v24 = vmov -inf   ;;  %335 = vst.msk [vmem:[#allocation4] sm:$0xff] %vm333_vm3, %v1024_v0  ;;  %v458_v26 = vand.u32 127, %v457_v25  ;;  %v460_v27 = vshrl.u32 %v457_v25, 7  ;;  %vm467_vm5 = vcmask 64512   ;;  %s706_s18 = sshll.u32 %s1175_s2, 3 }
  0x55   : > { %386 = vmatpush1.bf16.msra.mxu1 %v836_v4  ;;  %334 = vst.msk [vmem:[#allocation3] sm:$0xff] %vm333_vm3, %v1027_v24  ;;  %s717_s20 = sshll.u32 %s1009_s15, 7  ;;  %s263_s8 = scalar_lea.vmem [#allocation12], %s706_s18 }
  0x56   : > { %387 = vmatprep.subr.bf16.mxu1 %v838_v6  ;;  %v461_v28 = vsub.s32 %v458_v26, %v460_v27  ;;  %s577_s27 = sshll.u32 %s263_s8, 4  ;;  %s575_s30 = scalar_lea.hbm %s1246_s3, %s717_s20  ;;  %s578_s27 = int_to_ptr.vmem [resolvable:$true] %s577_s27 }
  0x57   : > { %730 = vmatpush3.bf16.msra.mxu0 %v837_v5  ;;  %s563_s4 = scalar_lea.sflag [#allocation8], %s1175_s2  ;;  %s929_s6 = scalar_lea.vmem %s578_s27, 128 }
  0x58   : > { %735 = vmatprep.subr.bf16.mxu0 %v1024_v0  ;;  %vm464_vm4 = vcmp.le.s32.totalorder %v461_v28, 0  ;;  %p930_p1 = scmp.ne.s32.totalorder %s578_s27, %s929_s6  ;;  %s1028_s24 = smov [#allocation12]  }
  0x59   : > { %388 = vmatpush1.bf16.msra.mxu1 %v840_v7  ;;  %s933_s23 = sshll.u32 %s1028_s24, 4  ;;  %s934_s23 = int_to_ptr.vmem [resolvable:$false] %s933_s23 }
  0x5a   : > { %732 = vmatmul.mubr.msk.bf16.vlgmr.msra.gmra.mxu0 %vm286_vm1, %v269_v8  ;;  %741 = vmatprep.subr.bf16.mxu1 %v1024_v0  ;;  %p931_p4 = pnand %p930_p1, %p1132_p0  ;;  %s935_s15 = scalar_lea.vmem %s934_s23, 256 }
  0x5b   : > { %737 = vmatprep.mubr.msk.bf16.mxu0 %vm1025_vm0, %v1024_v0  ;;  %v483_v47 = vld [vmem:[#allocation4] sm:$0xff]  ;;  %p936_p10 = scmp.lt.s32.totalorder %s578_s27, %s934_s23  ;;  %p937_p5 = scmp.lt.s32.totalorder %s935_s15, %s929_s6 }
  0x5c   : > { %714 = vmatmul.mubr.msk.bf16.vlgmr.msra.gmra.mxu1 %vm286_vm1, %v344_v9  ;;  %v466_v35 = vld [vmem:[#allocation3] sm:$0xff]  ;;  %p932_p8 = pneg %p931_p4 }
  0x5d   : > { %743 = vmatprep.mubr.msk.bf16.mxu1 %vm1025_vm0, %v1024_v0  ;;  %p938_p7 = por %p937_p5, %p936_p10 }
  0x5f   : > { %p939_p3 = pnand %p938_p7, %p932_p8 }
 0x11a   : > { %v324_v10 = vpop.f32.mrf.mxu0 }
 0x11b   : > { %v330_v11 = vmul.f32 0.25, %v324_v10 }
 0x11c   : > { %v407_v12 = vpop.f32.mrf.mxu1  ;;  %v733_v13 = vpop.f32.mrf.mxu0 }
 0x11d   : > { %v331_v14 = vpack.c.bf16 %v330_v11, %v330_v11  ;;  %v414_v15 = vpack.c.bf16 %v407_v12, %v407_v12 }
 0x11e   : > { %v409_v16 = vpop.f32.mrf.mxu1  ;;  %v327_v17 = vpop.f32.mrf.mxu0 }
 0x11f   : > { %332 = vst [vmem:[#allocation2] sm:$0xf] %v331_v14  ;;  %v415_v18 = vpack.c.bf16 %v409_v16, %v409_v16  ;;  %736 = vmatpush3.bf16.xpose.msra.mxu0 %v414_v15 }
 0x120   : > { %v411_v19 = vpop.f32.mrf.mxu1  ;;  %v734_v20 = vpop.f32.mrf.mxu0 }
 0x121   : > { %v497_v21 = vsel %vm495_vm2, %v415_v18, 0 }
 0x122   : > { %v412_v22 = vpop.f32.mrf.mxu1  ;;  %742 = vmatpush3.bf16.msra.mxu1 %v497_v21 }
 0x126   : > { %v416_v23 = vld [vmem:[#allocation2] sm:$0xf] }
 0x127   : > { %738 = vmatmul.mubr.bf16.vlgmr.msra.gmra.mxu0 %v416_v23 }
 0x1e7   : > { %v451_v29 = vpop.f32.mrf.mxu0 }
 0x1e8   : > { %v465_v30 = vsel %vm464_vm4, %v451_v29, -inf }
 0x1e9   : > { %v739_v31 = vpop.f32.mrf.mxu0  ;;  %v468_v32 = vsel %vm467_vm5, %v465_v30, -inf }
 0x1ea   : > { %469 = vmax.xlane.f32.xlu0 %v468_v32 }
 0x1eb   : > { %v454_v33 = vpop.f32.mrf.mxu0 }
 0x1ed   : > { %v740_v34 = vpop.f32.mrf.mxu0 }
 0x273   : > { %v470_v36 = vpop.xlane.xlu0 %469 }
 0x274   : > { %v471_v37 = vmax.f32 %v466_v35, %v470_v36 }
 0x276   : > { %v472_v38 = vsub.f32 %v466_v35, %v471_v37  ;;  %548 = vst.msk [vmem:[#allocation3] sm:$0xff] %vm333_vm3, %v471_v37  ;;  %477 = vperm.xlu0 %831, %v471_v37  }
 0x278   : > { %v473_v43 = vmul.f32 1.442695, %v472_v38 }
 0x2f1   : > { %v478_v39 = vpop.permute.xlu0 %477 }
 0x2f2   : > { %v480_v40 = vsub.f32 %v465_v30, %v478_v39 }
 0x2f4   : > { %v481_v41 = vmul.f32 1.442695, %v480_v40 }
 0x2f6   : > { %841 = vpow2.f32 %v481_v41 }
 0x2f7   : > { %843 = vpow2.f32 %v473_v43 }
 0x303   : > { %v842_v42 = vpop.eup %841 }
 0x304   : > { %v485_v44 = vsel %vm467_vm5, %v842_v42, 0.0  ;;  %v491_v45 = vpack.c.bf16 %v842_v42, %v842_v42  ;;  %v844_v46 = vpop.eup %843 }
 0x305   : > { %486 = vadd.xlane.f32.xlu1 %v485_v44  ;;  %v484_v48 = vmul.f32 %v844_v46, %v483_v47 }
 0x306   : > { %744 = vmatmul.mubr.msk.bf16.vlgmr.msra.gmra.mxu1 %vm467_vm5, %v491_v45 }
 0x316   : > { %542 = vperm.xlu1 %832, %v844_v46  }
 0x38e   : > { %v487_v49 = vpop.xlane.xlu1 %486 }
 0x38f   : > { %v488_v50 = vadd.f32 %v487_v49, %v484_v48 }
 0x391   : > { %490 = vst.msk [vmem:[#allocation4] sm:$0xff] %vm333_vm3, %v488_v50 }
 0x392   : > { %v543_v57 = vpop.permute.xlu1 %542 }
 0x393   : > { %v545_v58 = vmul.f32 0.0, %v543_v57 }
 0x398   : > { %v552_v51 = vld [vmem:[#allocation4] sm:$0xff] }
 0x399   : > { %845 = vrcp.f32 %v552_v51 }
 0x3a6   : > { %v846_v52 = vpop.eup %845 }
 0x3a7   : > { %557 = vperm.xlu1 %832, %v846_v52  }
 0x3c6   : > { %v533_v53 = vpop.f32.mrf.mxu1 }
 0x3c7   : > { %v546_v59 = vadd.f32 %v545_v58, %v533_v53 }
 0x3c8   : > { %v745_v54 = vpop.f32.mrf.mxu1 }
 0x3ca   : > { %v536_v55 = vpop.f32.mrf.mxu1 }
 0x3cc   : > { %v746_v56 = vpop.f32.mrf.mxu1 }
 0x422   : > { %v558_v60 = vpop.permute.xlu1 %557 }
 0x423   : > { %v560_v61 = vmul.f32 %v558_v60, %v546_v59 }
 0x425   : > { %561 = vst [vmem:[%s263_s8] sm:$0xff] %v560_v61 }
 0x426   : > { %942 = shalt.err (!%p939_p3)
}
 0x427   : > { %s943_s10 = scalar_lea.hbm %s575_s30, 128  ;;  %s947_s28 = scalar_lea.hbm %s1246_s3, 256 }
 0x428   : > { %p944_p2 = scmp.ne.s32.totalorder %s575_s30, %s943_s10  ;;  %p948_p12 = scmp.lt.s32.totalorder %s575_s30, %s1246_s3 }
 0x429   : > { %p949_p13 = scmp.lt.s32.totalorder %s947_s28, %s943_s10 }
 0x42a   : > { %p945_p6 = pnand %p944_p2, %p1132_p0 }
 0x42b   : > { %p950_p11 = por %p949_p13, %p948_p12 }
 0x42c   : > { %p946_p9 = pneg %p945_p6 }
 0x42e   : > { %p951_p1 = pnand %p950_p11, %p946_p9 }
 0x430   : > { %954 = shalt.err (!%p951_p1)
}
 0x431   : > { %755 = dma.vmem_to_hbm [thread:$0]  (%p1132_p0), %s578_s27, 128, %s575_s30, %s563_s4  }
 0x432 PF: > { %s589_s22 = sand.u32 1, %s997_s12   ;;  %p1257_p4 = scmp.ne.s32.totalorder %s1249_s21, 0 }
 0x433   : > { %p1258_p8 = scmp.ge.s32.totalorder %s1017_s17, 2  ;;  %s590_s18 = scalar_lea.sflag [#allocation8], %s589_s22 }
 0x435   : > { %p769_p10 = pnand %p1258_p8, %p1257_p4 }
 0x437   : > { %p770_p5 = pneg %p769_p10 }
 0x439   : > { %992 = dma.done.wait (%p770_p5), %s590_s18, 128  }
 0x43a   : > { %994 = vsyncadd (%p770_p5), %s590_s18, 4294967168  ;;  %s22_s17 = sadd.s32 1, %s1017_s17   ;;  %s1259_s12 = smov %s1001_s13 }
 0x43b   : > { %p19_p7 = scmp.ge.s32.totalorder %s22_s17, 4   ;;  %s1260_s13 = smov %s1005_s14 }
 0x43c   : > { %s1261_s14 = smov %s1141_s11  ;;  %s1262_s15 = smov %s1013_s16 }
 0x43d   : > { %s1263_s16 = smov %s1265_s26  ;;  %21 = sbr.rel (!%p19_p7) target bundleno = 10 (0xa), region = 106 }
 0x442   :  { %595 = vsyncpa [#allocation7], 1 }
 0x443   :  { %597 = vsyncpa [#allocation7 + $0x1], 1 }
 0x444   :  { %598 = vsyncpa [#allocation10], 1 }
 0x445   :  { %600 = vsyncpa [#allocation10 + $0x1], 1 }
 0x446   :  { %601 = vsyncpa [#allocation8], 1 }
 0x447   :  { %603 = vsyncpa [#allocation8 + $0x1], 1 }

// kernel: tpu_custom_call.1
= control target key start
LH: loop header
LB: loop body
LE: loop exit
PB: predicated region body
PF: predicated region fallthrough
CT: control target
= control target key end

     0   :  { %s1243_s0 = inlined_call_operand.hbm [shape: bf16[2,8,32], index: 0, kind: input, shape index: {}]   ;;  %s1244_s1 = inlined_call_operand.hbm [shape: bf16[2,8,32], index: 1, kind: input, shape index: {}]   ;;  %s1245_s2 = inlined_call_operand.hbm [shape: bf16[32,384], index: 2, kind: input, shape index: {}]   ;;  %s1246_s3 = inlined_call_operand.hbm [shape: f32[2,8,128], index: 3, kind: output, shape index: {}]  }
   0x1   :  { %1247 = sst [smem:[#allocation17_spill]] %s1245_s2 }
   0x2   :  { %8 = vsyncpa [#allocation7], 0 }
   0x3   :  { %10 = vsyncpa [#allocation7 + $0x1], 0 }
   0x4   :  { %11 = vsyncpa [#allocation10], 0 }
   0x5   :  { %13 = vsyncpa [#allocation10 + $0x1], 0 }
   0x6   :  { %14 = vsyncpa [#allocation8], 0 }
   0x7   :  { %16 = vsyncpa [#allocation8 + $0x1], 0  ;;  %s1049_s12 = smov 0   ;;  %s1051_s13 = smov 0  }
   0x8   :  { %s1053_s14 = smov 0   ;;  %s1055_s15 = smov 0  }
   0x9   :  { %s1057_s16 = smov 0   ;;  %s1059_s17 = smov 0  }
   0xa LB: > { %s1080_s18 = sadd.s32 4294967295, %s1017_s17   ;;  %s694_s19 = sadd.s32 4294967294, %s1017_s17   ;;  %s1017_s17 = sphi %s1059_s17, %s22_s17   ;;  %s1013_s16 = sphi %s1057_s16, %s1263_s16   ;;  %s1009_s15 = sphi %s1055_s15, %s1262_s15   ;;  %s1005_s14 = sphi %s1053_s14, %s1261_s14   ;;  %s1001_s13 = sphi %s1051_s13, %s1260_s13   ;;  %s997_s12 = sphi %s1049_s12, %s1259_s12  }
   0xb   : > { %p63_p0 = scmp.ne.s32.totalorder %s1001_s13, %s997_s12  ;;  %p64_p1 = scmp.eq.s32.totalorder %s1080_s18, 0 }
   0xc   : > { %p144_p3 = scmp.eq.s32.totalorder %s694_s19, 1  ;;  %p695_p5 = scmp.ge.s32.totalorder %s1017_s17, 1 }
   0xd   : > { %p1089_p4 = por %p64_p1, %p63_p0  ;;  %p151_p7 = scmp.lt.s32.totalorder %s1017_s17, 3 }
   0xe   : > { %p1094_p6 = por %p144_p3, %p63_p0  ;;  %s1019_s23 = smov [#allocation11]  }
   0xf   : > { %p1099_p8 = pnand %p695_p5, %p151_p7  ;;  %s163_s24 = sshll.u32 %s1019_s23, 4  ;;  %s164_s24 = int_to_ptr.vmem [resolvable:$true] %s163_s24 }
  0x10   : > { %s1249_s21 = scalar_select %p1094_p6, 1, 0 }
  0x11   : > { %p757_p9 = pneg %p1099_p8  ;;  %s41_s26 = sadd.s32 1, %s1013_s16 }
  0x12   : > { %s858_s27 = scalar_lea.vmem %s164_s24, 768  ;;  %p866_p5 = scmp.lt.s32.totalorder %s164_s24, %s164_s24 }
  0x13   : > { %p1108_p11 = pnand %p757_p9, %p64_p1  ;;  %p859_p13 = scmp.ne.s32.totalorder %s164_s24, %s858_s27 }
  0x14   : > { %p867_p7 = scmp.lt.s32.totalorder %s858_s27, %s858_s27 }
  0x15   : > { %p849_p12 = pneg %p1108_p11 }
  0x16   : > { %p868_p2 = por %p867_p7, %p866_p5 }
  0x17   : > { %p861_p0 = pnand %p859_p13, %p849_p12 }
  0x19   : > { %p862_p3 = pneg %p861_p0 }
  0x1b   : > { %p869_p6 = pnand %p868_p2, %p862_p3 }
  0x1d   : > { %872 = shalt.err (!%p869_p6)
}
  0x1e   : > { %s1020_s28 = smov 192   ;;  %s1021_s29 = smov 12  }
  0x1f   : > { %s1252_s2 = sld [smem:[#allocation17_spill]]  ;;  %p43_p2 = scmp.ge.s32.totalorder %s41_s26, 2 }
  0x20   : > { %s50_s5 = sadd.s32 1, %s1005_s14  ;;  %p57_p6 = scmp.ne.s32.totalorder %s1005_s14, %s1001_s13 }
  0x21   : > { %p58_p9 = scmp.eq.s32.totalorder %s1017_s17, 0  ;;  %s1265_s26 = smov (%p43_p2, %s41_s26), 0 }
  0x22   : > { %p1254_p13 = scmp.eq.s32.totalorder %s1080_s18, 1  ;;  %s45_s8 = ssub.s32 %s1013_s16, %s1265_s26 }
  0x23   : > { %p1126_p12 = por %p58_p9, %p57_p6  ;;  %p48_p3 = scmp.eq.s32.totalorder %s45_s8, 0 }
  0x24   : > { %p1132_p0 = por %p1254_p13, %p57_p6  ;;  %s177_s9 = sand.u32 1, %s1005_s14  }
  0x25   : > { %760 = dma.hbm_to_vmem [thread:$0]  (!%p1108_p11), %s1252_s2, 768, %s164_s24, [#allocation10], %s1020_s28, %s1020_s28, %s1021_s29  }
  0x26   : > { %p773_p11 = scmp.lt.s32.totalorder %s1017_s17, 2  ;;  %s698_s10 = sshll.u32 %s177_s9, 2 }
  0x27   : > { %s1141_s11 = scalar_select %p48_p3, %s1005_s14, %s50_s5  }
  0x28   : > { %s699_s19 = sshll.u32 %s1013_s16, 6  ;;  %s181_s27 = scalar_lea.vmem [#allocation6], %s698_s10 }
  0x29   : > { %s187_s25 = scalar_lea.hbm %s1243_s0, %s699_s19  ;;  %s189_s28 = sshll.u32 %s181_s27, 4  ;;  %s190_s28 = int_to_ptr.vmem [resolvable:$true] %s189_s28 }
  0x2a   : > { %p1149_p5 = pnand %p773_p11, %p1126_p12  ;;  %s1156_s5 = scalar_lea.hbm %s1244_s1, %s699_s19 }
  0x2b   : > { %s196_s8 = sand.u32 1, %s1017_s17   ;;  %s178_s2 = scalar_lea.sflag [#allocation7], %s177_s9 }
  0x2c   : > { %p875_p7 = pneg %p1149_p5  ;;  %s886_s23 = scalar_lea.vmem %s190_s28, 64 }
  0x2d   : > { %p887_p2 = scmp.ne.s32.totalorder %s190_s28, %s886_s23  ;;  %s1022_s6 = smov [#allocation6]  }
  0x2e   : > { %s891_s24 = sshll.u32 %s1022_s6, 4  ;;  %s892_s24 = int_to_ptr.vmem [resolvable:$false] %s891_s24 }
  0x2f   : > { %p889_p6 = pnand %p887_p2, %p875_p7  ;;  %s893_s27 = scalar_lea.vmem %s892_s24, 128 }
  0x30   : > { %p894_p12 = scmp.lt.s32.totalorder %s190_s28, %s892_s24  ;;  %p895_p13 = scmp.lt.s32.totalorder %s893_s27, %s886_s23 }
  0x31   : > { %p890_p9 = pneg %p889_p6 }
  0x32   : > { %p896_p11 = por %p895_p13, %p894_p12 }
  0x34   : > { %p897_p3 = pnand %p896_p11, %p890_p9 }
  0x36   : > { %900 = shalt.err (!%p897_p3)
}
  0x37   : > { %764 = dma.hbm_to_vmem [thread:$0]  (!%p1149_p5), %s187_s25, 64, %s190_s28, %s178_s2  }
  0x38   : > { %s200_s9 = scalar_lea.vmem [#allocation9], %s698_s10  ;;  %s197_s30 = scalar_lea.sflag [#allocation10], %s196_s8 }
  0x39   : > { %s208_s19 = sshll.u32 %s200_s9, 4  ;;  %s1023_s6 = smov [#allocation9]   ;;  %s209_s19 = int_to_ptr.vmem [resolvable:$true] %s208_s19 }
  0x3a   : > { %s914_s4 = scalar_lea.vmem %s209_s19, 64  ;;  %s919_s24 = sshll.u32 %s1023_s6, 4  ;;  %s920_s24 = int_to_ptr.vmem [resolvable:$false] %s919_s24 }
  0x3b   : > { %p915_p2 = scmp.ne.s32.totalorder %s209_s19, %s914_s4  ;;  %s921_s23 = scalar_lea.vmem %s920_s24, 128 }
  0x3c   : > { %p922_p9 = scmp.lt.s32.totalorder %s209_s19, %s920_s24  ;;  %p923_p12 = scmp.lt.s32.totalorder %s921_s23, %s914_s4 }
  0x3d   : > { %p917_p6 = pnand %p915_p2, %p875_p7 }
  0x3e   : > { %p924_p13 = por %p923_p12, %p922_p9 }
  0x3f   : > { %p918_p10 = pneg %p917_p6 }
  0x41   : > { %p925_p11 = pnand %p924_p13, %p918_p10 }
  0x43   : > { %928 = shalt.err (!%p925_p11)
}
  0x44   : > { %767 = dma.hbm_to_vmem [thread:$0]  (!%p1149_p5), %s1156_s5, 64, %s209_s19, %s197_s30  }
  0x45   : > { %217 = sbr.rel (%p1099_p8) target bundleno = 1074 (0x432), region = 32  ;;  %s1175_s2 = sand.u32 (!%p1099_p8), 1, %s1001_s13  }
  0x46   : > { %s703_s10 = sshll.u32 (!%p1099_p8), %s1175_s2, 2  ;;  %s220_s25 = scalar_lea.sflag (!%p1099_p8), [#allocation7], %s1175_s2 }
  0x47   : > { %s223_s28 = scalar_lea.vmem (!%p1099_p8), [#allocation6], %s703_s10 }
  0x4a   : > { %980 = dma.done.wait (%p1089_p4), %s220_s25, 64  }
  0x4b   : > { %982 = vsyncadd (%p1089_p4), %s220_s25, 4294967232  ;;  %s228_s29 = sand.u32 1, %s1080_s18   ;;  %s232_s22 = scalar_lea.vmem [#allocation9], %s703_s10 }
  0x4c   : > { %s229_s5 = scalar_lea.sflag [#allocation10], %s228_s29 }
  0x4d   : > { %984 = dma.done.wait (%p1089_p4), %s229_s5, 64  }
  0x4e   : > { %986 = vsyncadd (%p1089_p4), %s229_s5, 4294967232 }
  0x4f   : > { %988 = dma.done.wait (%p64_p1), [#allocation10], 768  }
  0x50   : > { %990 = vsyncadd (%p64_p1), [#allocation10], 4294966528  ;;  %v1024_v0 = vmov 0.0   ;;  %vm1025_vm0 = vmmov 0   ;;  %v1026_v1 = vmov 0   ;;  %vm286_vm1 = vcmask 261120  }
  0x51   : > { %727 = vmatprep.subr.bf16.mxu0 %v1024_v0  ;;  %731 = vmatprep.mubr.msk.bf16.mxu0 %vm1025_vm0, %v1024_v0  ;;  %v833_v2 = vld [vmem:[#allocation11 + $0x18] ss:$12 sps:$4 sm:$0xff]   ;;  %v834_v3 = vld [vmem:[#allocation11 + $0x20] ss:$12 sps:$4 sm:$0xff]   ;;  %v836_v4 = vld [vmem:[#allocation11 + $0x1c] ss:$12 sps:$4 sm:$0xff]   ;;  %v457_v25 = vlaneseq }
  0x52   : > { %405 = vmatprep.mubr.bf16.mxu1 %v1026_v1  ;;  %831 = vset.pattern.permute.xlu0 %v1026_v1  ;;  %v837_v5 = vld [vmem:[#allocation11] ss:$12 sps:$4 sm:$0xff]   ;;  %v838_v6 = vld [vmem:[#allocation11 + $0x8] ss:$12 sps:$4 sm:$0xff]   ;;  %v840_v7 = vld [vmem:[#allocation11 + $0x4] ss:$12 sps:$4 sm:$0xff]  }
  0x53   : > { %832 = vset.pattern.permute.xlu1 %v1026_v1  ;;  %728 = vmatpush3.bf16.msra.mxu0 %v833_v2  ;;  %v269_v8 = vld [vmem:[%s223_s28] sm:$0xf]  ;;  %v344_v9 = vld [vmem:[%s232_s22] sm:$0xf]  ;;  %vm495_vm2 = vcmask 1043456   ;;  %vm333_vm3 = vcmask 7168  }
  0x54   : > { %385 = vmatprep.subr.bf16.mxu1 %v834_v3  ;;  %729 = vmatprep.subr.bf16.mxu0 %v1024_v0  ;;  %v1027_v24 = vmov -inf   ;;  %335 = vst.msk [vmem:[#allocation4] sm:$0xff] %vm333_vm3, %v1024_v0  ;;  %v458_v26 = vand.u32 127, %v457_v25  ;;  %v460_v27 = vshrl.u32 %v457_v25, 7  ;;  %vm467_vm5 = vcmask 64512   ;;  %s706_s18 = sshll.u32 %s1175_s2, 3 }
  0x55   : > { %386 = vmatpush1.bf16.msra.mxu1 %v836_v4  ;;  %334 = vst.msk [vmem:[#allocation3] sm:$0xff] %vm333_vm3, %v1027_v24  ;;  %s717_s20 = sshll.u32 %s1009_s15, 7  ;;  %s263_s8 = scalar_lea.vmem [#allocation12], %s706_s18 }
  0x56   : > { %387 = vmatprep.subr.bf16.mxu1 %v838_v6  ;;  %v461_v28 = vsub.s32 %v458_v26, %v460_v27  ;;  %s577_s27 = sshll.u32 %s263_s8, 4  ;;  %s575_s30 = scalar_lea.hbm %s1246_s3, %s717_s20  ;;  %s578_s27 = int_to_ptr.vmem [resolvable:$true] %s577_s27 }
  0x57   : > { %730 = vmatpush3.bf16.msra.mxu0 %v837_v5  ;;  %s563_s4 = scalar_lea.sflag [#allocation8], %s1175_s2  ;;  %s929_s6 = scalar_lea.vmem %s578_s27, 128 }
  0x58   : > { %735 = vmatprep.subr.bf16.mxu0 %v1024_v0  ;;  %vm464_vm4 = vcmp.le.s32.totalorder %v461_v28, 0  ;;  %p930_p1 = scmp.ne.s32.totalorder %s578_s27, %s929_s6  ;;  %s1028_s24 = smov [#allocation12]  }
  0x59   : > { %388 = vmatpush1.bf16.msra.mxu1 %v840_v7  ;;  %s933_s23 = sshll.u32 %s1028_s24, 4  ;;  %s934_s23 = int_to_ptr.vmem [resolvable:$false] %s933_s23 }
  0x5a   : > { %732 = vmatmul.mubr.msk.bf16.vlgmr.msra.gmra.mxu0 %vm286_vm1, %v269_v8  ;;  %741 = vmatprep.subr.bf16.mxu1 %v1024_v0  ;;  %p931_p4 = pnand %p930_p1, %p1132_p0  ;;  %s935_s15 = scalar_lea.vmem %s934_s23, 256 }
  0x5b   : > { %737 = vmatprep.mubr.msk.bf16.mxu0 %vm1025_vm0, %v1024_v0  ;;  %v483_v47 = vld [vmem:[#allocation4] sm:$0xff]  ;;  %p936_p10 = scmp.lt.s32.totalorder %s578_s27, %s934_s23  ;;  %p937_p5 = scmp.lt.s32.totalorder %s935_s15, %s929_s6 }
  0x5c   : > { %714 = vmatmul.mubr.msk.bf16.vlgmr.msra.gmra.mxu1 %vm286_vm1, %v344_v9  ;;  %v466_v35 = vld [vmem:[#allocation3] sm:$0xff]  ;;  %p932_p8 = pneg %p931_p4 }
  0x5d   : > { %743 = vmatprep.mubr.msk.bf16.mxu1 %vm1025_vm0, %v1024_v0  ;;  %p938_p7 = por %p937_p5, %p936_p10 }
  0x5f   : > { %p939_p3 = pnand %p938_p7, %p932_p8 }
 0x11a   : > { %v324_v10 = vpop.f32.mrf.mxu0 }
 0x11b   : > { %v330_v11 = vmul.f32 0.25, %v324_v10 }
 0x11c   : > { %v407_v12 = vpop.f32.mrf.mxu1  ;;  %v733_v13 = vpop.f32.mrf.mxu0 }
 0x11d   : > { %v331_v14 = vpack.c.bf16 %v330_v11, %v330_v11  ;;  %v414_v15 = vpack.c.bf16 %v407_v12, %v407_v12 }
 0x11e   : > { %v409_v16 = vpop.f32.mrf.mxu1  ;;  %v327_v17 = vpop.f32.mrf.mxu0 }
 0x11f   : > { %332 = vst [vmem:[#allocation2] sm:$0xf] %v331_v14  ;;  %v415_v18 = vpack.c.bf16 %v409_v16, %v409_v16  ;;  %736 = vmatpush3.bf16.xpose.msra.mxu0 %v414_v15 }
 0x120   : > { %v411_v19 = vpop.f32.mrf.mxu1  ;;  %v734_v20 = vpop.f32.mrf.mxu0 }
 0x121   : > { %v497_v21 = vsel %vm495_vm2, %v415_v18, 0 }
 0x122   : > { %v412_v22 = vpop.f32.mrf.mxu1  ;;  %742 = vmatpush3.bf16.msra.mxu1 %v497_v21 }
 0x126   : > { %v416_v23 = vld [vmem:[#allocation2] sm:$0xf] }
 0x127   : > { %738 = vmatmul.mubr.bf16.vlgmr.msra.gmra.mxu0 %v416_v23 }
 0x1e7   : > { %v451_v29 = vpop.f32.mrf.mxu0 }
 0x1e8   : > { %v465_v30 = vsel %vm464_vm4, %v451_v29, -inf }
 0x1e9   : > { %v739_v31 = vpop.f32.mrf.mxu0  ;;  %v468_v32 = vsel %vm467_vm5, %v465_v30, -inf }
 0x1ea   : > { %469 = vmax.xlane.f32.xlu0 %v468_v32 }
 0x1eb   : > { %v454_v33 = vpop.f32.mrf.mxu0 }
 0x1ed   : > { %v740_v34 = vpop.f32.mrf.mxu0 }
 0x273   : > { %v470_v36 = vpop.xlane.xlu0 %469 }
 0x274   : > { %v471_v37 = vmax.f32 %v466_v35, %v470_v36 }
 0x276   : > { %v472_v38 = vsub.f32 %v466_v35, %v471_v37  ;;  %548 = vst.msk [vmem:[#allocation3] sm:$0xff] %vm333_vm3, %v471_v37  ;;  %477 = vperm.xlu0 %831, %v471_v37  }
 0x278   : > { %v473_v43 = vmul.f32 1.442695, %v472_v38 }
 0x2f1   : > { %v478_v39 = vpop.permute.xlu0 %477 }
 0x2f2   : > { %v480_v40 = vsub.f32 %v465_v30, %v478_v39 }
 0x2f4   : > { %v481_v41 = vmul.f32 1.442695, %v480_v40 }
 0x2f6   : > { %841 = vpow2.f32 %v481_v41 }
 0x2f7   : > { %843 = vpow2.f32 %v473_v43 }
 0x303   : > { %v842_v42 = vpop.eup %841 }
 0x304   : > { %v485_v44 = vsel %vm467_vm5, %v842_v42, 0.0  ;;  %v491_v45 = vpack.c.bf16 %v842_v42, %v842_v42  ;;  %v844_v46 = vpop.eup %843 }
 0x305   : > { %486 = vadd.xlane.f32.xlu1 %v485_v44  ;;  %v484_v48 = vmul.f32 %v844_v46, %v483_v47 }
 0x306   : > { %744 = vmatmul.mubr.msk.bf16.vlgmr.msra.gmra.mxu1 %vm467_vm5, %v491_v45 }
 0x316   : > { %542 = vperm.xlu1 %832, %v844_v46  }
 0x38e   : > { %v487_v49 = vpop.xlane.xlu1 %486 }
 0x38f   : > { %v488_v50 = vadd.f32 %v487_v49, %v484_v48 }
 0x391   : > { %490 = vst.msk [vmem:[#allocation4] sm:$0xff] %vm333_vm3, %v488_v50 }
 0x392   : > { %v543_v57 = vpop.permute.xlu1 %542 }
 0x393   : > { %v545_v58 = vmul.f32 0.0, %v543_v57 }
 0x398   : > { %v552_v51 = vld [vmem:[#allocation4] sm:$0xff] }
 0x399   : > { %845 = vrcp.f32 %v552_v51 }
 0x3a6   : > { %v846_v52 = vpop.eup %845 }
 0x3a7   : > { %557 = vperm.xlu1 %832, %v846_v52  }
 0x3c6   : > { %v533_v53 = vpop.f32.mrf.mxu1 }
 0x3c7   : > { %v546_v59 = vadd.f32 %v545_v58, %v533_v53 }
 0x3c8   : > { %v745_v54 = vpop.f32.mrf.mxu1 }
 0x3ca   : > { %v536_v55 = vpop.f32.mrf.mxu1 }
 0x3cc   : > { %v746_v56 = vpop.f32.mrf.mxu1 }
 0x422   : > { %v558_v60 = vpop.permute.xlu1 %557 }
 0x423   : > { %v560_v61 = vmul.f32 %v558_v60, %v546_v59 }
 0x425   : > { %561 = vst [vmem:[%s263_s8] sm:$0xff] %v560_v61 }
 0x426   : > { %942 = shalt.err (!%p939_p3)
}
 0x427   : > { %s943_s10 = scalar_lea.hbm %s575_s30, 128  ;;  %s947_s28 = scalar_lea.hbm %s1246_s3, 256 }
 0x428   : > { %p944_p2 = scmp.ne.s32.totalorder %s575_s30, %s943_s10  ;;  %p948_p12 = scmp.lt.s32.totalorder %s575_s30, %s1246_s3 }
 0x429   : > { %p949_p13 = scmp.lt.s32.totalorder %s947_s28, %s943_s10 }
 0x42a   : > { %p945_p6 = pnand %p944_p2, %p1132_p0 }
 0x42b   : > { %p950_p11 = por %p949_p13, %p948_p12 }
 0x42c   : > { %p946_p9 = pneg %p945_p6 }
 0x42e   : > { %p951_p1 = pnand %p950_p11, %p946_p9 }
 0x430   : > { %954 = shalt.err (!%p951_p1)
}
 0x431   : > { %755 = dma.vmem_to_hbm [thread:$0]  (%p1132_p0), %s578_s27, 128, %s575_s30, %s563_s4  }
 0x432 PF: > { %s589_s22 = sand.u32 1, %s997_s12   ;;  %p1257_p4 = scmp.ne.s32.totalorder %s1249_s21, 0 }
 0x433   : > { %p1258_p8 = scmp.ge.s32.totalorder %s1017_s17, 2  ;;  %s590_s18 = scalar_lea.sflag [#allocation8], %s589_s22 }
 0x435   : > { %p769_p10 = pnand %p1258_p8, %p1257_p4 }
 0x437   : > { %p770_p5 = pneg %p769_p10 }
 0x439   : > { %992 = dma.done.wait (%p770_p5), %s590_s18, 128  }
 0x43a   : > { %994 = vsyncadd (%p770_p5), %s590_s18, 4294967168  ;;  %s22_s17 = sadd.s32 1, %s1017_s17   ;;  %s1259_s12 = smov %s1001_s13 }
 0x43b   : > { %p19_p7 = scmp.ge.s32.totalorder %s22_s17, 4   ;;  %s1260_s13 = smov %s1005_s14 }
 0x43c   : > { %s1261_s14 = smov %s1141_s11  ;;  %s1262_s15 = smov %s1013_s16 }
 0x43d   : > { %s1263_s16 = smov %s1265_s26  ;;  %21 = sbr.rel (!%p19_p7) target bundleno = 10 (0xa), region = 106 }
 0x442   :  { %595 = vsyncpa [#allocation7], 1 }
 0x443   :  { %597 = vsyncpa [#allocation7 + $0x1], 1 }
 0x444   :  { %598 = vsyncpa [#allocation10], 1 }
 0x445   :  { %600 = vsyncpa [#allocation10 + $0x1], 1 }
 0x446   :  { %601 = vsyncpa [#allocation8], 1 }
 0x447   :  { %603 = vsyncpa [#allocation8 + $0x1], 1 }

</bundles_post_ra>
